<compile_context>
chip_gen: v7x
topology: tpu7x:2x2x1
jax: 0.10.0
libtpu: 0.0.40
codegen_flags: <defaults>
</compile_context>

<pallas_src>
import functools
import math

import jax
import jax.numpy as jnp
from jax.experimental import pallas as pl
from jax.experimental.pallas import tpu as pltpu


_VMEM_LIMIT_BYTES = 48 * 1024 * 1024   # explicit scoped-VMEM limit (safe on v5e/v6e/v7x)
_BLOCK_BUDGET_BYTES = 24 * 1024 * 1024  # target live bytes per pipelined grid step


# ---------------------------------------------------------------------------
# Kernels
# ---------------------------------------------------------------------------
def _layernorm_lane_kernel(x_ref, w_ref, b_ref, o_ref, *, eps, c):
    """Normalize over the last (lane) axis of an (T, C) block."""
    x = x_ref[...].astype(jnp.float32)
    inv_c = 1.0 / c
    mean = jnp.sum(x, axis=-1, keepdims=True) * inv_c
    xc = x - mean
    var = jnp.sum(xc * xc, axis=-1, keepdims=True) * inv_c
    inv = jax.lax.rsqrt(var + eps)                      # EUP slot
    y = xc * (inv * w_ref[...]) + b_ref[...]
    o_ref[...] = y.astype(o_ref.dtype)


def _layernorm_packed_kernel(x_ref, w_ref, b_ref, seg_ref, o_ref, *, eps, c):
    """Lane-dense small-C path: block (T, L) packs G = L // c logical rows per
    128-lane row.  Per-group reductions are done with a block-diagonal
    segment-sum matmul (MXU), keeping all loads/stores dense."""
    x = x_ref[...].astype(jnp.float32)                  # (T, L)
    seg = seg_ref[...]                                  # (L, L) group-sum matrix
    inv_c = 1.0 / c                                     # divide by TRUE C
    mean = jnp.dot(x, seg, preferred_element_type=jnp.float32) * inv_c
    xc = x - mean
    var = jnp.dot(xc * xc, seg, preferred_element_type=jnp.float32) * inv_c
    inv = jax.lax.rsqrt(var + eps)
    y = xc * (inv * w_ref[...]) + b_ref[...]            # w/b pre-tiled to (1, L)
    o_ref[...] = y.astype(o_ref.dtype)


def _layernorm_cf_kernel(x_ref, w_ref, b_ref, o_ref, *, eps, c):
    """channels_first: block (1, C, T_hw); reduce over the C (sublane) axis,
    H*W stays on the dense lane axis (no transposes needed)."""
    x = x_ref[...].astype(jnp.float32)                  # (1, C, T_hw)
    inv_c = 1.0 / c
    mean = jnp.sum(x, axis=1, keepdims=True) * inv_c    # (1, 1, T_hw)
    xc = x - mean
    var = jnp.sum(xc * xc, axis=1, keepdims=True) * inv_c
    inv = jax.lax.rsqrt(var + eps)
    w = w_ref[...][None]                                # (1, C, 1)
    b = b_ref[...][None]
    y = xc * inv * w + b
    o_ref[...] = y.astype(o_ref.dtype)


# ---------------------------------------------------------------------------
# Tile sizing (VMEM-budgeted, generation-safe)
# ---------------------------------------------------------------------------
def _pick_tile_rows(rows, row_elems, itemsize, max_tile=2048):
    # Live per step ≈ 2 double-buffered input blocks + 2 output blocks at the
    # I/O dtype + ~3 f32 temporaries inside the kernel.
    per_row = row_elems * (4 * itemsize + 3 * 4)
    tile = _BLOCK_BUDGET_BYTES // max(per_row, 1)
    tile = int(min(tile, max_tile))
    if tile >= rows:
        return rows                      # single block == full dim (always legal)
    return max(8, (tile // 8) * 8)       # sublane-aligned


def _pick_tile_hw(hw, c, itemsize, max_tile=32768):
    per_col = c * (4 * itemsize + 3 * 4)
    tile = _BLOCK_BUDGET_BYTES // max(per_col, 1)
    tile = int(min(tile, max_tile))
    if tile >= hw:
        return hw                        # single block == full dim (always legal)
    return max(128, (tile // 128) * 128)  # lane-aligned


def _compiler_params(dimension_semantics):
    return pltpu.CompilerParams(
        dimension_semantics=dimension_semantics,
        vmem_limit_bytes=_VMEM_LIMIT_BYTES,
    )


# ---------------------------------------------------------------------------
# Wrappers
# ---------------------------------------------------------------------------
def _layernorm_channels_last(x, weight, bias, eps):
    c = x.shape[-1]
    orig_shape = x.shape
    rows = math.prod(orig_shape[:-1])
    x2 = x.reshape(rows, c)
    itemsize = x.dtype.itemsize
    w_f32 = weight.astype(jnp.float32)
    b_f32 = bias.astype(jnp.float32)

    use_packed = (c < 128) and (128 % c == 0) and (rows % (128 // c) == 0)

    if use_packed:
        g = 128 // c
        l = 128
        prow = rows // g
        xp = x2.reshape(prow, l)                              # free reshape
        tile = _pick_tile_rows(prow, l, itemsize)
        lane = jnp.arange(l)
        seg = (lane[:, None] // c == lane[None, :] // c).astype(jnp.float32)
        wt = jnp.tile(w_f32, g).reshape(1, l)
        bt = jnp.tile(b_f32, g).reshape(1, l)
        out = pl.pallas_call(
            functools.partial(_layernorm_packed_kernel, eps=eps, c=c),
            out_shape=jax.ShapeDtypeStruct((prow, l), x.dtype),
            grid_spec=pltpu.PrefetchScalarGridSpec(
                num_scalar_prefetch=0,
                grid=(pl.cdiv(prow, tile),),
                in_specs=[
                    pl.BlockSpec((tile, l), lambda i: (i, 0)),
                    pl.BlockSpec((1, l), lambda i: (0, 0)),   # resident params
                    pl.BlockSpec((1, l), lambda i: (0, 0)),
                    pl.BlockSpec((l, l), lambda i: (0, 0)),   # resident seg matrix
                ],
                out_specs=pl.BlockSpec((tile, l), lambda i: (i, 0)),
            ),
            compiler_params=_compiler_params(("parallel",)),
        )(xp, wt, bt, seg)
        return out.reshape(orig_shape)

    # General lane-reduction path (C >= 128, or awkward small C — correctness
    # preserved; small C here just pays masked partial stores).
    tile = _pick_tile_rows(rows, c, itemsize)
    w2 = w_f32.reshape(1, c)
    b2 = b_f32.reshape(1, c)
    out = pl.pallas_call(
        functools.partial(_layernorm_lane_kernel, eps=eps, c=c),
        out_shape=jax.ShapeDtypeStruct((rows, c), x.dtype),
        grid_spec=pltpu.PrefetchScalarGridSpec(
            num_scalar_prefetch=0,
            grid=(pl.cdiv(rows, tile),),
            in_specs=[
                pl.BlockSpec((tile, c), lambda i: (i, 0)),
                pl.BlockSpec((1, c), lambda i: (0, 0)),
                pl.BlockSpec((1, c), lambda i: (0, 0)),
            ],
            out_specs=pl.BlockSpec((tile, c), lambda i: (i, 0)),
        ),
        compiler_params=_compiler_params(("parallel",)),
    )(x2, w2, b2)
    return out.reshape(orig_shape)


def _layernorm_channels_first(x, weight, bias, eps):
    b, c, h, w = x.shape
    hw = h * w
    x3 = x.reshape(b, c, hw)                                  # free reshape, NO transpose
    tile_hw = _pick_tile_hw(hw, c, x.dtype.itemsize)
    w2 = weight.reshape(c, 1).astype(jnp.float32)
    b2 = bias.reshape(c, 1).astype(jnp.float32)
    out = pl.pallas_call(
        functools.partial(_layernorm_cf_kernel, eps=eps, c=c),
        out_shape=jax.ShapeDtypeStruct((b, c, hw), x.dtype),
        grid_spec=pltpu.PrefetchScalarGridSpec(
            num_scalar_prefetch=0,
            grid=(b, pl.cdiv(hw, tile_hw)),
            in_specs=[
                pl.BlockSpec((1, c, tile_hw), lambda i, j: (i, 0, j)),
                pl.BlockSpec((c, 1), lambda i, j: (0, 0)),
                pl.BlockSpec((c, 1), lambda i, j: (0, 0)),
            ],
            out_specs=pl.BlockSpec((1, c, tile_hw), lambda i, j: (i, 0, j)),
        ),
        compiler_params=_compiler_params(("parallel", "parallel")),
    )(x3, w2, b2)
    return out.reshape(b, c, h, w)


class LayerNorm:
    """JAX/Pallas port of the PyTorch LayerNorm (channels_last / channels_first)."""

    def __init__(self, normalized_shape, eps=1e-6, data_format="channels_last"):
        if data_format not in ("channels_last", "channels_first"):
            raise NotImplementedError
        self.weight = jnp.ones((normalized_shape,), dtype=jnp.float32)
        self.bias = jnp.zeros((normalized_shape,), dtype=jnp.float32)
        self.eps = eps
        self.data_format = data_format
        self.normalized_shape = (normalized_shape,)

    def __call__(self, x):
        c = self.normalized_shape[0]
        if self.data_format == "channels_last":
            assert x.shape[-1] == c
            return _layernorm_channels_last(x, self.weight, self.bias, self.eps)
        else:
            assert x.shape[1] == c
            return _layernorm_channels_first(x, self.weight, self.bias, self.eps)


# ---------------------------------------------------------------------------
# Pure-JAX references (match the PyTorch module semantics)
# ---------------------------------------------------------------------------
def _ref_layernorm_channels_first(x, w, b, eps):
    u = jnp.mean(x, axis=1, keepdims=True)
    s = jnp.mean((x - u) ** 2, axis=1, keepdims=True)
    xn = (x - u) / jnp.sqrt(s + eps)
    return w[None, :, None, None] * xn + b[None, :, None, None]


def _ref_layernorm_channels_last(x, w, b, eps):
    u = jnp.mean(x, axis=-1, keepdims=True)
    s = jnp.mean((x - u) ** 2, axis=-1, keepdims=True)
    xn = (x - u) / jnp.sqrt(s + eps)
    return xn * w + b


if __name__ == "__main__":
    key = jax.random.PRNGKey(0)
    k1, k2, k3, k4 = jax.random.split(key, 4)

    B, C, H, W = 2, 4, 16, 16

    # channels_first: (B, C, H, W) — sublane-reduction kernel, no transposes.
    x_cf = jax.random.normal(k1, (B, C, H, W), dtype=jnp.float32)
    ln_cf = LayerNorm(C, eps=1e-6, data_format="channels_first")
    ln_cf.weight = 1.0 + 0.1 * jax.random.normal(k2, (C,), dtype=jnp.float32)
    ln_cf.bias = 0.05 * jax.random.normal(k3, (C,), dtype=jnp.float32)
    y_cf = jax.block_until_ready(ln_cf(x_cf))
    y_cf_ref = _ref_layernorm_channels_first(x_cf, ln_cf.weight, ln_cf.bias, ln_cf.eps)
    assert y_cf.shape == x_cf.shape
    assert jnp.allclose(y_cf, y_cf_ref, atol=1e-5, rtol=1e-5)

    # channels_last: (B, H, W, C) with C=4 — packed lane-dense (MXU segment-sum) path.
    x_cl = jax.random.normal(k4, (B, H, W, C), dtype=jnp.float32)
    ln_cl = LayerNorm(C, eps=1e-6, data_format="channels_last")
    ln_cl.weight = ln_cf.weight
    ln_cl.bias = ln_cf.bias
    y_cl = jax.block_until_ready(ln_cl(x_cl))
    y_cl_ref = _ref_layernorm_channels_last(x_cl, ln_cl.weight, ln_cl.bias, ln_cl.eps)
    assert y_cl.shape == x_cl.shape
    assert jnp.allclose(y_cl, y_cl_ref, atol=1e-5, rtol=1e-5)

    # channels_last with large C (>=128) — exercises the general lane-reduction path.
    C2 = 256
    x_big = jax.random.normal(k1, (2, 8, 8, C2), dtype=jnp.float32)
    ln_big = LayerNorm(C2, eps=1e-6, data_format="channels_last")
    ln_big.weight = 1.0 + 0.1 * jax.random.normal(k2, (C2,), dtype=jnp.float32)
    ln_big.bias = 0.05 * jax.random.normal(k3, (C2,), dtype=jnp.float32)
    y_big = jax.block_until_ready(ln_big(x_big))
    y_big_ref = _ref_layernorm_channels_last(x_big, ln_big.weight, ln_big.bias, ln_big.eps)
    assert jnp.allclose(y_big, y_big_ref, atol=1e-5, rtol=1e-5)

    print("KERNEL_OK")
</pallas_src>

<mosaic_0001>
module attributes {stable_mosaic.version = 11 : i64} {
  func.func @_layernorm_cf_kernel(%arg0: i32, %arg1: i32, %arg2: memref<1x4x256xf32, #tpu.memory_space<vmem>>, %arg3: memref<4x1xf32, #tpu.memory_space<vmem>>, %arg4: memref<4x1xf32, #tpu.memory_space<vmem>>, %arg5: memref<1x4x256xf32, #tpu.memory_space<vmem>>) attributes {dimension_semantics = [#tpu.dimension_semantics<parallel>, #tpu.dimension_semantics<parallel>], iteration_bounds = array<i64: 2, 1>, scalar_prefetch = 0 : i64, scratch_operands = 0 : i64, tpu.core_type = #tpu.core_type<tc>, window_params = [{transform_indices = @transform_0, window_bounds = array<i64: 1, 4, 256>}, {pipeline_mode = #tpu.pipeline_mode<synchronous>, transform_indices = @transform_1, window_bounds = array<i64: 4, 1>}, {pipeline_mode = #tpu.pipeline_mode<synchronous>, transform_indices = @transform_2, window_bounds = array<i64: 4, 1>}, {transform_indices = @transform_3, window_bounds = array<i64: 1, 4, 256>}]} {
    %c0 = arith.constant 0 : index
    %c0_0 = arith.constant 0 : index
    %c0_1 = arith.constant 0 : index
    %0 = vector.load %arg2[%c0, %c0_0, %c0_1] : memref<1x4x256xf32, #tpu.memory_space<vmem>>, vector<1x4x256xf32>
    %cst = arith.constant dense<0.000000e+00> : vector<1x256xf32>
    %1 = vector.multi_reduction <add>, %0, %cst [1] : vector<1x4x256xf32> to vector<1x256xf32>
    %2 = vector.shape_cast %1 : vector<1x256xf32> to vector<1x1x256xf32>
    %cst_2 = arith.constant 2.500000e-01 : f32
    %3 = vector.broadcast %cst_2 : f32 to vector<1x1x256xf32>
    %4 = arith.mulf %2, %3 : vector<1x1x256xf32>
    %5 = vector.broadcast %4 : vector<1x1x256xf32> to vector<1x4x256xf32>
    %6 = arith.subf %0, %5 : vector<1x4x256xf32>
    %7 = arith.mulf %6, %6 : vector<1x4x256xf32>
    %cst_3 = arith.constant dense<0.000000e+00> : vector<1x256xf32>
    %8 = vector.multi_reduction <add>, %7, %cst_3 [1] : vector<1x4x256xf32> to vector<1x256xf32>
    %9 = vector.shape_cast %8 : vector<1x256xf32> to vector<1x1x256xf32>
    %cst_4 = arith.constant 2.500000e-01 : f32
    %10 = vector.broadcast %cst_4 : f32 to vector<1x1x256xf32>
    %11 = arith.mulf %9, %10 : vector<1x1x256xf32>
    %cst_5 = arith.constant 9.99999997E-7 : f32
    %12 = vector.broadcast %cst_5 : f32 to vector<1x1x256xf32>
    %13 = arith.addf %11, %12 : vector<1x1x256xf32>
    %14 = math.rsqrt %13 : vector<1x1x256xf32>
    %c0_6 = arith.constant 0 : index
    %c0_7 = arith.constant 0 : index
    %15 = vector.load %arg3[%c0_6, %c0_7] : memref<4x1xf32, #tpu.memory_space<vmem>>, vector<4x1xf32>
    %16 = vector.shape_cast %15 : vector<4x1xf32> to vector<1x4x1xf32>
    %c0_8 = arith.constant 0 : index
    %c0_9 = arith.constant 0 : index
    %17 = vector.load %arg4[%c0_8, %c0_9] : memref<4x1xf32, #tpu.memory_space<vmem>>, vector<4x1xf32>
    %18 = vector.shape_cast %17 : vector<4x1xf32> to vector<1x4x1xf32>
    %19 = vector.broadcast %14 : vector<1x1x256xf32> to vector<1x4x256xf32>
    %20 = arith.mulf %6, %19 : vector<1x4x256xf32>
    %21 = vector.broadcast %16 : vector<1x4x1xf32> to vector<1x4x256xf32>
    %22 = arith.mulf %20, %21 : vector<1x4x256xf32>
    %23 = vector.broadcast %18 : vector<1x4x1xf32> to vector<1x4x256xf32>
    %24 = arith.addf %22, %23 : vector<1x4x256xf32>
    %c0_10 = arith.constant 0 : index
    %c0_11 = arith.constant 0 : index
    %c0_12 = arith.constant 0 : index
    %25 = vector.load %arg5[%c0_10, %c0_11, %c0_12] : memref<1x4x256xf32, #tpu.memory_space<vmem>>, vector<1x4x256xf32>
    tpu.vector_store %arg5[%c0_10, %c0_11, %c0_12], %24 {strides = array<i32>} : memref<1x4x256xf32, #tpu.memory_space<vmem>>, vector<1x4x256xf32>,
    return
  }
  func.func @transform_0(%arg0: i32, %arg1: i32) -> (i32, i32, i32) {
    %c0_i32 = arith.constant 0 : i32
    %c0_i32_0 = arith.constant 0 : i32
    return %arg0, %c0_i32, %arg1 : i32, i32, i32
  }
  func.func @transform_1(%arg0: i32, %arg1: i32) -> (i32, i32) {
    %c0_i32 = arith.constant 0 : i32
    %c0_i32_0 = arith.constant 0 : i32
    %c0_i32_1 = arith.constant 0 : i32
    return %c0_i32, %c0_i32_0 : i32, i32
  }
  func.func @transform_2(%arg0: i32, %arg1: i32) -> (i32, i32) {
    %c0_i32 = arith.constant 0 : i32
    %c0_i32_0 = arith.constant 0 : i32
    %c0_i32_1 = arith.constant 0 : i32
    return %c0_i32, %c0_i32_0 : i32, i32
  }
  func.func @transform_3(%arg0: i32, %arg1: i32) -> (i32, i32, i32) {
    %c0_i32 = arith.constant 0 : i32
    %c0_i32_0 = arith.constant 0 : i32
    return %arg0, %c0_i32, %arg1 : i32, i32, i32
  }
}

</mosaic_0001>

<bundles_post_ra>
// kernel: tpu_custom_call.1
= control target key start
LH: loop header
LB: loop body
LE: loop exit
PB: predicated region body
PF: predicated region fallthrough
CT: control target
= control target key end

     0   :  { %8 = vsyncpa [#allocation3], 0  ;;  %s803_s0 = inlined_call_operand.hbm [shape: f32[2,4,256], index: 0, kind: input, shape index: {}]   ;;  %s804_s1 = inlined_call_operand.vmem [shape: f32[4,1], index: 1, kind: input, shape index: {}]   ;;  %s805_s2 = inlined_call_operand.vmem [shape: f32[4,1], index: 2, kind: input, shape index: {}]   ;;  %s806_s3 = inlined_call_operand.hbm [shape: f32[2,4,256], index: 3, kind: output, shape index: {}]  }
   0x1   :  { %10 = vsyncpa [#allocation3 + $0x1], 0 }
   0x2   :  { %11 = vsyncpa [#allocation4], 0 }
   0x3   :  { %13 = vsyncpa [#allocation4 + $0x1], 0  ;;  %s617_s12 = smov 0   ;;  %s619_s13 = smov 0  }
   0x4   :  { %s621_s14 = smov 0   ;;  %s623_s15 = smov 0  }
   0x5   :  { %s625_s16 = smov 0   ;;  %s627_s17 = smov 0  }
   0x6 LB: > { %s392_s18 = sadd.s32 4294967295, %s591_s17   ;;  %s393_s19 = sadd.s32 4294967294, %s591_s17   ;;  %s591_s17 = sphi %s627_s17, %s19_s17   ;;  %s587_s16 = sphi %s625_s16, %s822_s16   ;;  %s583_s15 = sphi %s623_s15, %s821_s15   ;;  %s579_s14 = sphi %s621_s14, %s820_s14   ;;  %s575_s13 = sphi %s619_s13, %s819_s13   ;;  %s571_s12 = sphi %s617_s12, %s818_s12  }
   0x7   : > { %s31_s20 = sadd.s32 1, %s587_s16  ;;  %s40_s21 = sadd.s32 1, %s579_s14 }
   0x8   : > { %p33_p0 = scmp.ge.s32.totalorder %s31_s20, 2  ;;  %p47_p1 = scmp.ne.s32.totalorder %s579_s14, %s575_s13 }
   0x9   : > { %p48_p2 = scmp.eq.s32.totalorder %s591_s17, 0  ;;  %p53_p3 = scmp.ne.s32.totalorder %s575_s13, %s571_s12 }
   0xa   : > { %s824_s20 = smov (%p33_p0, %s31_s20), 0  ;;  %p54_p5 = scmp.eq.s32.totalorder %s392_s18, 0 }
   0xb   : > { %p658_p4 = por %p48_p2, %p47_p1  ;;  %s35_s23 = ssub.s32 %s587_s16, %s824_s20 }
   0xc   : > { %p121_p6 = scmp.eq.s32.totalorder %s392_s18, 1  ;;  %p38_p7 = scmp.eq.s32.totalorder %s35_s23, 0 }
   0xd   : > { %p664_p8 = por %p54_p5, %p53_p3  ;;  %p127_p10 = scmp.eq.s32.totalorder %s393_s19, 1 }
   0xe   : > { %p668_p9 = por %p121_p6, %p47_p1  ;;  %p421_p13 = scmp.lt.s32.totalorder %s591_s17, 2 }
   0xf   : > { %s673_s26 = scalar_select %p38_p7, %s579_s14, %s40_s21  }
  0x10   : > { %s810_s25 = scalar_select %p668_p9, 1, 0 }
  0x11   : > { %p675_p11 = por %p127_p10, %p53_p3  ;;  %s153_s28 = sand.u32 1, %s579_s14  }
  0x12   : > { %s396_s29 = sshll.u32 %s153_s28, 3  ;;  %s407_s30 = sshll.u32 %s587_s16, 7 }
  0x13   : > { %s811_s27 = scalar_select %p675_p11, 1, 0 }
  0x14   : > { %s686_s6 = scalar_lea.hbm %s803_s0, %s407_s30  ;;  %s157_s7 = scalar_lea.vmem [#allocation2], %s396_s29 }
  0x15   : > { %s167_s8 = sshll.u32 %s157_s7, 4  ;;  %p692_p0 = pnand %p421_p13, %p658_p4  ;;  %s688_s8 = int_to_ptr.vmem [resolvable:$true] %s167_s8 }
  0x16   : > { %s154_s10 = scalar_lea.sflag [#allocation3], %s153_s28  ;;  %s479_s11 = scalar_lea.hbm %s686_s6, 128 }
  0x17   : > { %p480_p3 = scmp.ne.s32.totalorder %s686_s6, %s479_s11  ;;  %p481_p5 = pneg %p692_p0 }
  0x18   : > { %s484_s21 = scalar_lea.hbm %s803_s0, 256  ;;  %p485_p4 = scmp.lt.u32.totalorder %s686_s6, %s803_s0 }
  0x19   : > { %p482_p6 = pnand %p481_p5, %p480_p3  ;;  %p486_p10 = scmp.lt.u32.totalorder %s484_s21, %s479_s11 }
  0x1a   : > { %p488_p12 = scmp.lt.u32.totalorder %s479_s11, %s686_s6 }
  0x1b   : > { %p483_p7 = pneg %p482_p6  ;;  %p487_p13 = por %p486_p10, %p485_p4 }
  0x1d   : > { %p489_p1 = por %p488_p12, %p487_p13 }
  0x1f   : > { %p490_p2 = pnand %p489_p1, %p483_p7 }
  0x21   : > { %493 = shalt.err (!%p490_p2)
}
  0x22   : > { %s494_s28 = scalar_lea.vmem %s688_s8, 128  ;;  %s593_s29 = smov [#allocation2]  }
  0x23   : > { %p495_p3 = scmp.ne.s32.totalorder %s688_s8, %s494_s28  ;;  %s499_s30 = sshll.u32 %s593_s29, 4  ;;  %s500_s30 = int_to_ptr.vmem [resolvable:$false] %s499_s30 }
  0x24   : > { %s501_s4 = scalar_lea.vmem %s500_s30, 256  ;;  %p502_p9 = scmp.lt.s32.totalorder %s688_s8, %s500_s30 }
  0x25   : > { %p497_p6 = pnand %p495_p3, %p481_p5  ;;  %p503_p4 = scmp.lt.s32.totalorder %s501_s4, %s494_s28 }
  0x27   : > { %p498_p11 = pneg %p497_p6  ;;  %p504_p10 = por %p503_p4, %p502_p9 }
  0x29   : > { %p505_p12 = pnand %p504_p10, %p498_p11 }
  0x2b   : > { %508 = shalt.err (!%p505_p12)
}
  0x2c   : > { %416 = dma.hbm_to_vmem [thread:$0]  (!%p692_p0), %s686_s6, 128, %s688_s8, %s154_s10  }
  0x2d   : > { %p813_p1 = scmp.lt.s32.totalorder %s591_s17, 3  ;;  %p814_p2 = scmp.ge.s32.totalorder %s591_s17, 1 }
  0x2f   : > { %p173_p5 = pnand %p814_p2, %p813_p1 }
  0x30   : > { %s728_s5 = sand.u32 (!%p173_p5), 1, %s575_s13  }
  0x31   : > { %176 = sbr.rel (%p173_p5) target bundleno = 209 (0xd1), region = 32  ;;  %s400_s7 = sshll.u32 (!%p173_p5), %s728_s5, 3 }
  0x32   : > { %s179_s11 = scalar_lea.sflag (!%p173_p5), [#allocation3], %s728_s5  ;;  %s182_s9 = scalar_lea.vmem (!%p173_p5), [#allocation2], %s400_s7 }
  0x38   : > { %562 = dma.done.wait (%p664_p8), %s179_s11, 128  }
  0x39   : > { %564 = vsyncadd (%p664_p8), %s179_s11, 4294967168  ;;  %v594_v0 = vmov 0   ;;  %v257_v1 = vld [vmem:[%s804_s1] sm:$0xf]  ;;  %vm211_vm0 = vcmask 1043456   ;;  %v271_v45 = vlaneseq  ;;  %s408_s24 = sshll.u32 %s583_s15, 7 }
  0x3a   : > { %473 = vset.pattern.permute.xlu0 %v594_v0  ;;  %v258_v2 = vld [vmem:[%s805_s2] sm:$0xf]  ;;  %v595_v43 = vmov 839922192   ;;  %s204_s19 = scalar_lea.vmem [#allocation5], %s400_s7  ;;  %s754_s28 = scalar_lea.hbm %s806_s3, %s408_s24 }
  0x3b   : > { %266 = vperm.xlu0 %473, %v257_v1   ;;  %v207_v3 = vld [vmem:[%s182_s9] sm:$0xff]  ;;  %v269_v44 = vunpack.c.l.s4 %v595_v43  ;;  %v272_v48 = vshrl.u32 %v271_v45, 7  ;;  %s308_s21 = sshll.u32 %s204_s19, 4  ;;  %s292_s29 = scalar_lea.sflag [#allocation4], %s728_s5  ;;  %s756_s21 = int_to_ptr.vmem [resolvable:$true] %s308_s21 }
  0x3c   : > { %v209_v4 = vcombine.high %v207_v3, %v207_v3  ;;  %v212_v5 = vsel %vm211_vm0, %v207_v3, 0.0  ;;  %s509_s30 = scalar_lea.vmem %s756_s21, 128  ;;  %p815_p9 = scmp.ne.s32.totalorder %s810_s25, 0 }
  0x3d   : > { %v213_v7 = vrot.slane %v212_v5, 4  ;;  %v270_v47 = vunpack.c.0.s8 %v269_v44  ;;  %p510_p8 = scmp.ne.s32.totalorder %s756_s21, %s509_s30  ;;  %s596_s15 = smov [#allocation5]  }
  0x3e   : > { %v219_v6 = vsel %vm211_vm0, %v209_v4, 0.0  ;;  %s513_s4 = sshll.u32 %s596_s15, 4  ;;  %s514_s4 = int_to_ptr.vmem [resolvable:$false] %s513_s4 }
  0x3f   : > { %279 = vperm.xlu0 %473, %v258_v2   ;;  %v220_v8 = vrot.slane %v219_v6, 4  ;;  %v214_v9 = vadd.f32 %v213_v7, %v212_v5  ;;  %v273_v50 = vsub.s32 %v270_v47, %v272_v48  ;;  %p511_p11 = pnand %p510_p8, %p815_p9  ;;  %s515_s7 = scalar_lea.vmem %s514_s4, 256 }
  0x40   : > { %p516_p7 = scmp.lt.s32.totalorder %s756_s21, %s514_s4  ;;  %p517_p13 = scmp.lt.s32.totalorder %s515_s7, %s509_s30 }
  0x41   : > { %v221_v10 = vadd.f32 %v220_v8, %v219_v6  ;;  %v215_v11 = vrot.slane %v214_v9, 2  ;;  %p512_p0 = pneg %p511_p11 }
  0x42   : > { %p518_p3 = por %p517_p13, %p516_p7 }
  0x43   : > { %v222_v12 = vrot.slane %v221_v10, 2  ;;  %v216_v13 = vadd.f32 %v215_v11, %v214_v9 }
  0x44   : > { %p519_p6 = pnand %p518_p3, %p512_p0 }
  0x45   : > { %v223_v14 = vadd.f32 %v222_v12, %v221_v10  ;;  %v217_v15 = vrot.slane %v216_v13, 1 }
  0x47   : > { %v224_v16 = vrot.slane %v223_v14, 1  ;;  %v218_v17 = vadd.f32 %v217_v15, %v216_v13 }
  0x49   : > { %v225_v18 = vadd.f32 %v224_v16, %v223_v14  ;;  %v226_v19 = vmul.f32 0.25, %v218_v17 }
  0x4b   : > { %v227_v20 = vmul.f32 0.25, %v225_v18 }
  0x4d   : > { %v230_v21 = vcombine.low %v226_v19, %v227_v20 }
  0x4f   : > { %v232_v22 = vsub.f32 %v207_v3, %v230_v21 }
  0x51   : > { %v233_v23 = vmul.f32 %v232_v22, %v232_v22 }
  0x53   : > { %v235_v24 = vcombine.high %v233_v23, %v233_v23  ;;  %v237_v25 = vsel %vm211_vm0, %v233_v23, 0.0 }
  0x54   : > { %v238_v27 = vrot.slane %v237_v25, 4 }
  0x55   : > { %v244_v26 = vsel %vm211_vm0, %v235_v24, 0.0 }
  0x56   : > { %v245_v28 = vrot.slane %v244_v26, 4  ;;  %v239_v29 = vadd.f32 %v238_v27, %v237_v25 }
  0x58   : > { %v246_v30 = vadd.f32 %v245_v28, %v244_v26  ;;  %v240_v31 = vrot.slane %v239_v29, 2 }
  0x5a   : > { %v247_v32 = vrot.slane %v246_v30, 2  ;;  %v241_v33 = vadd.f32 %v240_v31, %v239_v29 }
  0x5c   : > { %v248_v34 = vadd.f32 %v247_v32, %v246_v30  ;;  %v242_v35 = vrot.slane %v241_v33, 1 }
  0x5e   : > { %v249_v36 = vrot.slane %v248_v34, 1  ;;  %v243_v37 = vadd.f32 %v242_v35, %v241_v33 }
  0x60   : > { %v250_v38 = vadd.f32 %v249_v36, %v248_v34  ;;  %v251_v39 = vmul.f32 0.25, %v243_v37 }
  0x62   : > { %v252_v40 = vmul.f32 0.25, %v250_v38  ;;  %v253_v41 = vadd.f32 1e-06, %v251_v39 }
  0x64   : > { %v254_v42 = vadd.f32 1e-06, %v252_v40  ;;  %475 = vrsqrt.f32 %v253_v41 }
  0x66   : > { %477 = vrsqrt.f32 %v254_v42 }
  0x6e   : > { %v476_v46 = vpop.eup %475 }
  0x70   : > { %v478_v49 = vpop.eup %477 }
  0x71   : > { %v261_v51 = vcombine.low %v476_v46, %v478_v49 }
  0x73   : > { %v263_v53 = vmul.f32 %v261_v51, %v232_v22 }
  0xba   : > { %v267_v52 = vpop.permute.xlu0 %266 }
  0xbb   : > { %v274_v54 = vrot.slane %v267_v52, %v273_v50 }
  0xbd   : > { %v276_v56 = vmul.f32 %v274_v54, %v263_v53 }
  0xbe   : > { %v280_v55 = vpop.permute.xlu0 %279 }
  0xbf   : > { %v287_v57 = vrot.slane %v280_v55, %v273_v50 }
  0xc1   : > { %v289_v58 = vadd.f32 %v287_v57, %v276_v56 }
  0xc3   : > { %290 = vst [vmem:[%s204_s19] sm:$0xff] %v289_v58 }
  0xc4   : > { %522 = shalt.err (!%p519_p6)
}
  0xc5   : > { %s523_s5 = scalar_lea.hbm %s754_s28, 128  ;;  %s527_s6 = scalar_lea.hbm %s806_s3, 256 }
  0xc6   : > { %p524_p4 = scmp.ne.s32.totalorder %s754_s28, %s523_s5  ;;  %p528_p1 = scmp.lt.u32.totalorder %s754_s28, %s806_s3 }
  0xc7   : > { %p529_p2 = scmp.lt.u32.totalorder %s527_s6, %s523_s5  ;;  %p531_p8 = scmp.lt.u32.totalorder %s523_s5, %s754_s28 }
  0xc8   : > { %p525_p10 = pnand %p524_p4, %p815_p9 }
  0xc9   : > { %p530_p5 = por %p529_p2, %p528_p1 }
  0xca   : > { %p526_p12 = pneg %p525_p10 }
  0xcb   : > { %p532_p11 = por %p531_p8, %p530_p5 }
  0xcd   : > { %p533_p0 = pnand %p532_p11, %p526_p12 }
  0xcf   : > { %536 = shalt.err (!%p533_p0)
}
  0xd0   : > { %411 = dma.vmem_to_hbm [thread:$0]  (%p815_p9), %s756_s21, 128, %s754_s28, %s292_s29  }
  0xd1 PF: > { %s320_s18 = sand.u32 1, %s571_s12   ;;  %p816_p7 = scmp.ne.s32.totalorder %s811_s27, 0 }
  0xd2   : > { %p817_p13 = scmp.ge.s32.totalorder %s591_s17, 2  ;;  %s321_s24 = scalar_lea.sflag [#allocation4], %s320_s18 }
  0xd4   : > { %p418_p3 = pnand %p817_p13, %p816_p7 }
  0xd6   : > { %566 = dma.done.wait (!%p418_p3), %s321_s24, 128  }
  0xd7   : > { %568 = vsyncadd (!%p418_p3), %s321_s24, 4294967168  ;;  %s19_s17 = sadd.s32 1, %s591_s17   ;;  %s818_s12 = smov %s575_s13 }
  0xd8   : > { %p16_p6 = scmp.ge.s32.totalorder %s19_s17, 4   ;;  %s819_s13 = smov %s579_s14 }
  0xd9   : > { %s820_s14 = smov %s673_s26  ;;  %s821_s15 = smov %s587_s16 }
  0xda   : > { %s822_s16 = smov %s824_s20  ;;  %18 = sbr.rel (!%p16_p6) target bundleno = 6 (0x6), region = 77 }
  0xe1   :  { %326 = vsyncpa [#allocation3], 1 }
  0xe2   :  { %328 = vsyncpa [#allocation3 + $0x1], 1 }
  0xe3   :  { %329 = vsyncpa [#allocation4], 1 }
  0xe4   :  { %331 = vsyncpa [#allocation4 + $0x1], 1 }

</bundles_post_ra>
